<compile_context>
chip_gen: v6e
topology: v6e:2x2x1
jax: 0.10.0
libtpu: 0.0.40
codegen_flags: <defaults>
</compile_context>

<pallas_src>
import jax
import jax.numpy as jnp
from jax.experimental import pallas as pl
from jax.experimental.pallas import tpu as pltpu


def _round_up(x, m):
    return ((x + m - 1) // m) * m


def _box_kernel(h_ref, w_ref, b_ref, noise_ref, out_ref):
    """Kernel body. All tensors are batch-on-lane.

    h_ref:     (K, TB)        hidden-state tile
    w_ref:     (K, 1) if N==1 else (N, K)
    b_ref:     (N, 1)
    noise_ref: (N, TB)        pre-scaled Gaussian noise
    out_ref:   (2*N, TB)      rows [0:N] = mu, rows [N:2N] = d_t
    """
    n = b_ref.shape[0]
    h = h_ref[...]                    # (K, TB) f32
    b = b_ref[...]                    # (N, 1)  f32

    if n == 1:
        # Per-column dot product: VPU multiply + K=32 sublane reduce (no MXU).
        z = jnp.sum(w_ref[...] * h, axis=0, keepdims=True) + b        # (1, TB)
    else:
        # Generic small-N path: MXU matmul with a lane-dense (N, TB) result.
        z = jnp.dot(w_ref[...], h, preferred_element_type=jnp.float32) + b

    mu = jnp.tanh(z)                                                   # (N, TB)
    d = jnp.clip(mu + noise_ref[...], 0.3, 0.9)                        # (N, TB)

    # Two unmasked lane-dense row stores.
    out_ref[0:n, :] = mu.astype(out_ref.dtype)
    out_ref[n:, :] = d.astype(out_ref.dtype)


def box_network_forward(h_t, weight, bias, std, key, *, block_b=None):
    """box_network forward.

    Args:
      h_t:    (B, K) float32 hidden state.
      weight: (N, K) float32 -- native PyTorch nn.Linear layout.
      bias:   (N,) or (1, N) float32.
      std:    python float, noise standard deviation.
      key:    jax PRNG key for the Gaussian noise.
      block_b: optional batch tile size (multiple of 128).

    Returns:
      mu:  (B, N) float32
      d_t: (B, N) float32
    """
    B, K = h_t.shape
    N, K2 = weight.shape
    assert K == K2, (K, K2)

    weight = jnp.asarray(weight, jnp.float32)
    bias_col = jnp.asarray(bias, jnp.float32).reshape(N, 1)

    # Batch tile: lane-dense (multiple of 128), big enough to amortize per-step
    # overhead, capped at 4096 to stay well inside v5e's 16 MiB scoped VMEM.
    # For B > 4096 this automatically produces >= 2 "parallel" grid blocks so
    # v7x's two TensorCores both get work.
    if block_b is None:
        block_b = min(4096, _round_up(B, 128))
    assert block_b % 128 == 0, block_b

    b_pad = _round_up(B, block_b)
    n_blocks = b_pad // block_b

    # Batch on the lane axis for the whole pipeline.
    h_kb = h_t.astype(jnp.float32).T                                  # (K, B)
    if b_pad != B:
        h_kb = jnp.pad(h_kb, ((0, 0), (0, b_pad - B)))

    # Host-side Gaussian noise (reproducible, independent of tiling/padding).
    noise = jax.random.normal(key, (N, B), dtype=jnp.float32) * jnp.float32(std)
    if b_pad != B:
        noise = jnp.pad(noise, ((0, 0), (0, b_pad - B)))

    # Weight layout: (K, 1) for the N==1 sublane-reduce path, (N, K) for MXU.
    w_in = weight.T if N == 1 else weight
    w_spec = pl.BlockSpec(w_in.shape, lambda i: (0, 0))

    bytes_accessed = 4 * (b_pad * K + w_in.size + N + b_pad * N + 2 * b_pad * N)
    cost = pl.CostEstimate(
        flops=2 * b_pad * K * N + 4 * b_pad * N,
        transcendentals=b_pad * N,
        bytes_accessed=bytes_accessed,
    )

    packed = pl.pallas_call(
        _box_kernel,
        out_shape=jax.ShapeDtypeStruct((2 * N, b_pad), jnp.float32),
        grid=(n_blocks,),
        in_specs=[
            pl.BlockSpec((K, block_b), lambda i: (0, i)),      # h tile
            w_spec,                                            # weight (pinned)
            pl.BlockSpec((N, 1), lambda i: (0, 0)),            # bias (pinned)
            pl.BlockSpec((N, block_b), lambda i: (0, i)),      # noise tile
        ],
        out_specs=pl.BlockSpec((2 * N, block_b), lambda i: (0, i)),
        compiler_params=pltpu.CompilerParams(
            dimension_semantics=("parallel",),
        ),
        cost_estimate=cost,
    )(h_kb, w_in, bias_col, noise)

    mu = packed[:N, :B].T          # (B, N)
    d_t = packed[N:, :B].T         # (B, N)
    return mu, d_t


if __name__ == "__main__":
    # Small shapes consistent with the module: hidden size 32, output size 1.
    B = 8
    input_size = 32
    output_size = 1
    std = 0.1

    key = jax.random.PRNGKey(0)
    k_h, k_w, k_b, k_noise = jax.random.split(key, 4)

    # h_t: hidden state of the core network.
    h_t = jax.random.normal(k_h, (B, input_size), dtype=jnp.float32)

    # Deterministic Linear params (PyTorch-style uniform init bound 1/sqrt(fan_in)).
    bound = 1.0 / (input_size ** 0.5)
    weight = jax.random.uniform(
        k_w, (output_size, input_size), minval=-bound, maxval=bound,
        dtype=jnp.float32)
    bias = jax.random.uniform(
        k_b, (output_size,), minval=-bound, maxval=bound, dtype=jnp.float32)

    mu, d_t = box_network_forward(h_t, weight, bias, std, k_noise)
    jax.block_until_ready((mu, d_t))

    assert mu.shape == (B, output_size) and d_t.shape == (B, output_size)

    # Pure-JAX reference (same noise draw as the wrapper).
    mu_ref = jnp.tanh(h_t @ weight.T + bias[None, :])
    noise_ref = (jax.random.normal(k_noise, (output_size, B), dtype=jnp.float32)
                 * jnp.float32(std)).T
    d_ref = jnp.clip(mu_ref + noise_ref, 0.3, 0.9)

    assert jnp.allclose(mu, mu_ref, atol=1e-5), "mu mismatch"
    assert jnp.allclose(d_t, d_ref, atol=1e-5), "d_t mismatch"
    assert jnp.all(d_t >= 0.3 - 1e-6) and jnp.all(d_t <= 0.9 + 1e-6), \
        "d_t out of clamp range"

    # Exercise the padded / multi-block path as well (B not a multiple of 128).
    B2 = 200
    h2 = jax.random.normal(jax.random.PRNGKey(3), (B2, input_size),
                           dtype=jnp.float32)
    k_noise2 = jax.random.PRNGKey(7)
    mu2, d2 = box_network_forward(h2, weight, bias, std, k_noise2, block_b=128)
    jax.block_until_ready((mu2, d2))
    mu2_ref = jnp.tanh(h2 @ weight.T + bias[None, :])
    noise2_ref = (jax.random.normal(k_noise2, (output_size, B2),
                                    dtype=jnp.float32) * jnp.float32(std)).T
    d2_ref = jnp.clip(mu2_ref + noise2_ref, 0.3, 0.9)
    assert jnp.allclose(mu2, mu2_ref, atol=1e-5), "mu mismatch (tiled)"
    assert jnp.allclose(d2, d2_ref, atol=1e-5), "d_t mismatch (tiled)"

    print("KERNEL_OK")
</pallas_src>

<mosaic_0001>
module attributes {stable_mosaic.version = 11 : i64} {
  func.func @_box_kernel(%arg0: i32, %arg1: memref<32x128xf32, #tpu.memory_space<vmem>>, %arg2: memref<32x1xf32, #tpu.memory_space<vmem>>, %arg3: memref<1x1xf32, #tpu.memory_space<vmem>>, %arg4: memref<1x128xf32, #tpu.memory_space<vmem>>, %arg5: memref<2x128xf32, #tpu.memory_space<vmem>>) attributes {dimension_semantics = [#tpu.dimension_semantics<parallel>], iteration_bounds = array<i64: 1>, scalar_prefetch = 0 : i64, scratch_operands = 0 : i64, tpu.core_type = #tpu.core_type<tc>, window_params = [{transform_indices = @transform_0, window_bounds = array<i64: 32, 128>}, {pipeline_mode = #tpu.pipeline_mode<synchronous>, transform_indices = @transform_1, window_bounds = array<i64: 32, 1>}, {pipeline_mode = #tpu.pipeline_mode<synchronous>, transform_indices = @transform_2, window_bounds = array<i64: 1, 1>}, {transform_indices = @transform_3, window_bounds = array<i64: 1, 128>}, {transform_indices = @transform_4, window_bounds = array<i64: 2, 128>}]} {
    %c0 = arith.constant 0 : index
    %c0_0 = arith.constant 0 : index
    %0 = vector.load %arg1[%c0, %c0_0] : memref<32x128xf32, #tpu.memory_space<vmem>>, vector<32x128xf32>
    %c0_1 = arith.constant 0 : index
    %c0_2 = arith.constant 0 : index
    %1 = vector.load %arg3[%c0_1, %c0_2] : memref<1x1xf32, #tpu.memory_space<vmem>>, vector<1x1xf32>
    %c0_3 = arith.constant 0 : index
    %c0_4 = arith.constant 0 : index
    %2 = vector.load %arg2[%c0_3, %c0_4] : memref<32x1xf32, #tpu.memory_space<vmem>>, vector<32x1xf32>
    %3 = vector.broadcast %2 : vector<32x1xf32> to vector<32x128xf32>
    %4 = arith.mulf %3, %0 : vector<32x128xf32>
    %cst = arith.constant dense<0.000000e+00> : vector<128xf32>
    %5 = vector.multi_reduction <add>, %4, %cst [0] : vector<32x128xf32> to vector<128xf32>
    %6 = vector.shape_cast %5 : vector<128xf32> to vector<1x128xf32>
    %7 = vector.broadcast %1 : vector<1x1xf32> to vector<1x128xf32>
    %8 = arith.addf %6, %7 : vector<1x128xf32>
    %9 = math.tanh %8 : vector<1x128xf32>
    %c0_5 = arith.constant 0 : index
    %c0_6 = arith.constant 0 : index
    %10 = vector.load %arg4[%c0_5, %c0_6] : memref<1x128xf32, #tpu.memory_space<vmem>>, vector<1x128xf32>
    %11 = arith.addf %9, %10 : vector<1x128xf32>
    %cst_7 = arith.constant 3.000000e-01 : f32
    %cst_8 = arith.constant 0.899999976 : f32
    %12 = vector.broadcast %cst_7 : f32 to vector<1x128xf32>
    %13 = arith.maximumf %12, %11 : vector<1x128xf32>
    %14 = vector.broadcast %cst_8 : f32 to vector<1x128xf32>
    %15 = arith.minimumf %14, %13 : vector<1x128xf32>
    %c0_9 = arith.constant 0 : index
    %c0_10 = arith.constant 0 : index
    %16 = vector.load %arg5[%c0_9, %c0_10] : memref<2x128xf32, #tpu.memory_space<vmem>>, vector<1x128xf32>
    tpu.vector_store %arg5[%c0_9, %c0_10], %9 {strides = array<i32>} : memref<2x128xf32, #tpu.memory_space<vmem>>, vector<1x128xf32>,
    %c1 = arith.constant 1 : index
    %c0_11 = arith.constant 0 : index
    %17 = vector.load %arg5[%c1, %c0_11] : memref<2x128xf32, #tpu.memory_space<vmem>>, vector<1x128xf32>
    tpu.vector_store %arg5[%c1, %c0_11], %15 {strides = array<i32>} : memref<2x128xf32, #tpu.memory_space<vmem>>, vector<1x128xf32>,
    return
  }
  func.func @transform_0(%arg0: i32) -> (i32, i32) {
    %c0_i32 = arith.constant 0 : i32
    %c0_i32_0 = arith.constant 0 : i32
    return %c0_i32, %arg0 : i32, i32
  }
  func.func @transform_1(%arg0: i32) -> (i32, i32) {
    %c0_i32 = arith.constant 0 : i32
    %c0_i32_0 = arith.constant 0 : i32
    %c0_i32_1 = arith.constant 0 : i32
    return %c0_i32, %c0_i32_0 : i32, i32
  }
  func.func @transform_2(%arg0: i32) -> (i32, i32) {
    %c0_i32 = arith.constant 0 : i32
    %c0_i32_0 = arith.constant 0 : i32
    %c0_i32_1 = arith.constant 0 : i32
    return %c0_i32, %c0_i32_0 : i32, i32
  }
  func.func @transform_3(%arg0: i32) -> (i32, i32) {
    %c0_i32 = arith.constant 0 : i32
    %c0_i32_0 = arith.constant 0 : i32
    return %c0_i32, %arg0 : i32, i32
  }
  func.func @transform_4(%arg0: i32) -> (i32, i32) {
    %c0_i32 = arith.constant 0 : i32
    %c0_i32_0 = arith.constant 0 : i32
    return %c0_i32, %arg0 : i32, i32
  }
}

</mosaic_0001>

<bundles_post_ra>
// kernel: tpu_custom_call.1
= control target key start
LH: loop header
LB: loop body
LE: loop exit
PB: predicated region body
PF: predicated region fallthrough
CT: control target
= control target key end

     0   :  { %s181_s0 = inlined_call_operand.vmem [shape: f32[32,128], index: 0, kind: input, shape index: {}]   ;;  %s182_s1 = inlined_call_operand.vmem [shape: f32[32,1], index: 1, kind: input, shape index: {}]   ;;  %s183_s2 = inlined_call_operand.<no memory space> [shape: f32[1,1], index: 2, kind: input, shape index: {}]   ;;  %s184_s3 = inlined_call_operand.vmem [shape: f32[1,128], index: 3, kind: input, shape index: {}]   ;;  %s185_s4 = inlined_call_operand.hbm [shape: f32[2,128], index: 4, kind: output, shape index: {}]  }
   0x1   :  { %v9_v0 = vstv %s183_s2 }
   0x2   :  { %10 = vst [vmem:[#allocation2] sm:$0x1] %v9_v0 }
   0x3   :  { %v27_v1 = vld [vmem:[%s182_s1 + $0x10] sm:$0xff]  ;;  %v25_v2 = vld [vmem:[%s182_s1] sm:$0xff]  ;;  %v121_v3 = vmov 0   ;;  %v28_v4 = vld [vmem:[%s182_s1 + $0x18] sm:$0xff] }
   0x4   :  { %96 = vset.pattern.permute.xlu1 %v121_v3  ;;  %95 = vset.pattern.permute.xlu0 %v121_v3  ;;  %v26_v5 = vld [vmem:[%s182_s1 + $0x8] sm:$0xff] }
   0x5   :  { %41 = vperm.xlu1 %96, %v27_v1   ;;  %31 = vperm.xlu0 %95, %v25_v2  }
   0x6   :  { %11 = vsyncpa [#allocation4], 0  ;;  %v20_v9 = vld [vmem:[%s181_s0] sm:$0xff]  ;;  %v21_v10 = vld [vmem:[%s181_s0 + $0x8] sm:$0xff]  ;;  %v67_v22 = vlaneseq  ;;  %s122_s6 = smov [#allocation3]  }
   0x7   :  { %v22_v11 = vld [vmem:[%s181_s0 + $0x10] sm:$0xff]  ;;  %v23_v16 = vld [vmem:[%s181_s0 + $0x18] sm:$0xff]  ;;  %v73_v34 = vld [vmem:[%s184_s3] sm:$0x1]  ;;  %s85_s7 = sshll.u32 %s122_s6, 4  ;;  %s86_s7 = int_to_ptr.vmem [resolvable:$true] %s85_s7 }
   0x8   :  { %v68_v24 = vshrl.u32 %v67_v22, 7  ;;  %s99_s8 = scalar_lea.vmem %s86_s7, 32  ;;  %p104_p1 = scmp.lt.s32.totalorder %s86_s7, %s86_s7 }
   0x9   :  { %46 = vperm.xlu1 %96, %v28_v4   ;;  %36 = vperm.xlu0 %95, %v26_v5   ;;  %v24_v6 = vld [vmem:[#allocation2] sm:$0x1]  ;;  %p100_p0 = scmp.ne.s32.totalorder %s86_s7, %s99_s8  ;;  %p105_p2 = scmp.lt.s32.totalorder %s99_s8, %s99_s8 }
   0xa   :  { %v69_v27 = vsub.s32 0, %v68_v24 }
   0xb   :  { %p106_p3 = por %p105_p2, %p104_p1 }
   0xd   :  { %64 = vperm.xlu0 %95, %v24_v6   ;;  %p107_p4 = pnand %p106_p3, %p100_p0 }
  0x80   :  { %v42_v7 = vpop.permute.xlu1 %41  ;;  %v32_v8 = vpop.permute.xlu0 %31 }
  0x81   :  { %v49_v13 = vmul.f32 %v32_v8, %v20_v9  ;;  %v51_v17 = vmul.f32 %v42_v7, %v22_v11 }
  0x84   :  { %v37_v12 = vpop.permute.xlu0 %36  ;;  %v47_v15 = vpop.permute.xlu1 %46 }
  0x85   :  { %v50_v14 = vmul.f32 %v37_v12, %v21_v10  ;;  %v52_v19 = vmul.f32 %v47_v15, %v23_v16 }
  0x87   :  { %v53_v18 = vadd.f32 %v50_v14, %v49_v13 }
  0x88   :  { %v65_v29 = vpop.permute.xlu0 %64 }
  0x89   :  { %v54_v20 = vadd.f32 %v53_v18, %v51_v17  ;;  %v70_v32 = vrot.slane %v65_v29, %v69_v27 }
  0x8b   :  { %v55_v21 = vadd.f32 %v54_v20, %v52_v19 }
  0x8d   :  { %v56_v23 = vrot.slane %v55_v21, 4 }
  0x8f   :  { %v57_v25 = vadd.f32 %v56_v23, %v55_v21 }
  0x91   :  { %v58_v26 = vrot.slane %v57_v25, 2 }
  0x93   :  { %v59_v28 = vadd.f32 %v58_v26, %v57_v25 }
  0x95   :  { %v60_v30 = vrot.slane %v59_v28, 1 }
  0x97   :  { %v61_v31 = vadd.f32 %v60_v30, %v59_v28 }
  0x99   :  { %v71_v33 = vadd.f32 %v70_v32, %v61_v31 }
  0x9b   :  { %97 = vtanh.f32 %v71_v33 }
  0xa8   :  { %v98_v35 = vpop.eup %97 }
  0xa9   :  { %77 = vst [vmem:[#allocation3] sm:$0x1] %v98_v35  ;;  %v74_v36 = vadd.f32 %v98_v35, %v73_v34 }
  0xab   :  { %v75_v37 = vmax.f32 %v74_v36, 0.3 }
  0xad   :  { %v76_v38 = vmin.f32 %v75_v37, 0.9 }
  0xaf   :  { %78 = vst [vmem:[#allocation3 + $0x1] sm:$0x1] %v76_v38 }
  0xb0   :  { %110 = shalt.err (!%p107_p4)
}
  0xb1   :  { %88 = dma.vmem_to_hbm [thread:$0]  %s86_s7, 32, %s185_s4, [#allocation4]  }
  0xb2   :  { %119 = dma.done.wait [#allocation4], 32  }
  0xb3   :  { %120 = vsyncadd [#allocation4], 4294967264 }
  0xb4   :  { %92 = vsyncpa [#allocation4], 1 }

</bundles_post_ra>
